<compile_context>
chip_gen: v6e
topology: v6e:2x2x1
jax: 0.10.0
libtpu: 0.0.40
codegen_flags: <defaults>
</compile_context>

<pallas_src>
import functools

import jax
import jax.numpy as jnp
from jax.experimental import pallas as pl
from jax.experimental.pallas import tpu as pltpu


STAGE_CHANNELS = (16, 32, 64, 128)    # scaled down from (256, 512, 1024, 2048)
SE_REDUCTION = 4                      # scaled down from 16 (same bottleneck ratio)
LANES = 128
ACT_DTYPE = jnp.bfloat16              # streamed activation dtype (math stays f32)
MAX_SP_TILE = 512                     # packed rows per pipelined grid step
VMEM_LIMIT_BYTES = 32 * 1024 * 1024   # fits v7x's smaller scoped VMEM with headroom


# ---------------------------------------------------------------------------
# Pallas kernel 1: streaming lane-sum reduction over the packed activation.
# ---------------------------------------------------------------------------
def _lane_sum_kernel(x_ref, o_ref):
    s = pl.program_id(1)

    @pl.when(s == 0)
    def _():
        o_ref[...] = jnp.zeros_like(o_ref)

    # bf16 tile streamed from HBM, accumulated in f32 (pure add-tree; the 1/Sp
    # divide is deferred to the tiny head kernel).
    o_ref[...] += jnp.sum(x_ref[...].astype(jnp.float32), axis=1, keepdims=True)


def _choose_sp_tile(sp, max_tile=MAX_SP_TILE):
    if sp <= max_tile:
        return sp
    start = max_tile - (max_tile % 16)
    for t in range(start, 15, -16):        # multiple of 16 -> bf16 (16,128) packing
        if sp % t == 0:
            return t
    return sp


def lane_sums(x_packed):
    """x_packed: (B, Sp, 128) bf16 -> (B, 128) f32 per-lane sums over Sp."""
    B, Sp, L = x_packed.shape
    tile = _choose_sp_tile(Sp)
    out = pl.pallas_call(
        _lane_sum_kernel,
        out_shape=jax.ShapeDtypeStruct((B, 1, L), jnp.float32),
        grid=(B, Sp // tile),
        in_specs=[pl.BlockSpec((1, tile, L), lambda b, s: (b, s, 0))],
        out_specs=pl.BlockSpec((1, 1, L), lambda b, s: (b, 0, 0)),
        compiler_params=pltpu.CompilerParams(
            dimension_semantics=("parallel", "arbitrary"),
            vmem_limit_bytes=VMEM_LIMIT_BYTES),
    )(x_packed)
    return out.reshape(B, L)


# ---------------------------------------------------------------------------
# Pallas kernel 2: SE head (GAP finalize + FC -> ReLU -> FC -> Sigmoid).
# One gridless call per stage over the whole batch (M = B, weights DMA'd once).
# ---------------------------------------------------------------------------
def _se_head_kernel(sum_ref, w1p_ref, w2p_ref, scale_ref, *, inv_sp):
    m = sum_ref[...] * inv_sp                                   # (B,128) lane means
    h = jnp.maximum(
        jnp.dot(m, w1p_ref[...], preferred_element_type=jnp.float32), 0.0)
    scale_ref[...] = jax.nn.sigmoid(
        jnp.dot(h, w2p_ref[...], preferred_element_type=jnp.float32))


def se_head(sums, w1p, w2p, inv_sp):
    B = sums.shape[0]
    return pl.pallas_call(
        functools.partial(_se_head_kernel, inv_sp=inv_sp),
        out_shape=jax.ShapeDtypeStruct((B, LANES), jnp.float32),
        compiler_params=pltpu.CompilerParams(vmem_limit_bytes=VMEM_LIMIT_BYTES),
    )(sums, w1p, w2p)


# ---------------------------------------------------------------------------
# Pallas kernel 3: fused stage-4 head.
#   x_attr    = distortion_attention4(x)  -> identity stand-in = x
#   x_texture = se4(x)                    -> x * z
#   fused     = HNCA stand-in             -> 0.5 * (x_attr + x_texture)
#   out       = GAP(fused)                -> per-channel-mean * 0.5 * (1 + z)
# (z is spatially constant for the stand-ins, so the pool commutes with the
#  scale and the scaled activation is never materialized.)
# ---------------------------------------------------------------------------
def _se4_head_kernel(sum_ref, w1p_ref, w2p_ref, o_ref, *, inv_sp):
    m = sum_ref[...] * inv_sp                                   # (B,128) per-channel GAP
    h = jnp.maximum(
        jnp.dot(m, w1p_ref[...], preferred_element_type=jnp.float32), 0.0)
    z = jax.nn.sigmoid(
        jnp.dot(h, w2p_ref[...], preferred_element_type=jnp.float32))
    o_ref[...] = m * (0.5 * (1.0 + z))


def se4_head(sums, w1p, w2p, inv_sp):
    B = sums.shape[0]
    return pl.pallas_call(
        functools.partial(_se4_head_kernel, inv_sp=inv_sp),
        out_shape=jax.ShapeDtypeStruct((B, LANES), jnp.float32),
        compiler_params=pltpu.CompilerParams(vmem_limit_bytes=VMEM_LIMIT_BYTES),
    )(sums, w1p, w2p)


# ---------------------------------------------------------------------------
# Weight / activation packing helpers (hoisted out of the per-call path)
# ---------------------------------------------------------------------------
def _pack_se_weights(w1, w2):
    """w1: fc[0].weight (Cmid, C); w2: fc[2].weight (C, Cmid) — PyTorch layout.

    Bakes the lane fold/unfold (channel = lane % C) and the 1/G group-average
    into pre-transposed f32 weights, zero-padded to 128x128 so both FC matmuls
    are lane-dense and MXU-native (zero Cmid columns/rows are inert through
    ReLU and FC2)."""
    cmid, c = w1.shape
    assert LANES % c == 0, f"channel count {c} must divide {LANES}"
    # TODO(synk): real ResNetSE channels (256..2048) need a C >= 128 branch
    # (channels already lane-dense; fold over spatial only).
    g = LANES // c
    lane_chan = jnp.arange(LANES) % c
    onehot = (lane_chan[:, None] == jnp.arange(c)[None, :]).astype(jnp.float32)  # (128,C)
    w1p = (onehot / g) @ w1.T.astype(jnp.float32)            # (128, Cmid)
    w2p = w2.T.astype(jnp.float32) @ onehot.T                # (Cmid, 128)
    w1p = jnp.pad(w1p, ((0, 0), (0, LANES - cmid)))
    w2p = jnp.pad(w2p, ((0, LANES - cmid), (0, 0)))
    return w1p, w2p


def _pack_lanes(x_bhwc):
    B, H, W, C = x_bhwc.shape
    assert (H * W * C) % LANES == 0 and LANES % C == 0
    return x_bhwc.reshape(B, (H * W * C) // LANES, LANES)


# ---------------------------------------------------------------------------
# Plain-JAX glue / stand-ins for undefined submodules
# ---------------------------------------------------------------------------
def _avgpool2x2(x):
    B, H, W, C = x.shape
    return x.reshape(B, H // 2, 2, W // 2, 2, C).mean(axis=(2, 4))


def _stage_standin(x, w_proj, n_down, scale_c=None):
    # TODO(synk): resnet50 layer0..layer4 definitions were not provided; this is
    # a deterministic avg-pool-downsample + 1x1-projection + ReLU stand-in that
    # reproduces the channel/spatial shape progression only.
    for _ in range(n_down):
        x = _avgpool2x2(x)
    if scale_c is None:
        y = jnp.einsum("bhwc,cd->bhwd", x, w_proj,
                       preferred_element_type=jnp.float32)
    else:
        # Previous stage's SE per-channel scale applied as a pre-scale of this
        # projection (commutes with the linear stand-in) => the SE-scaled
        # activation is never written back to HBM.
        y = jnp.einsum("bhwc,bc,cd->bhwd", x, scale_c, w_proj,
                       preferred_element_type=jnp.float32)
    return jnp.maximum(y, 0.0).astype(ACT_DTYPE)


def _distortion_attention_standin(x):
    # TODO(synk): DistortionAttention definition was not provided; identity stand-in.
    return x


# ---------------------------------------------------------------------------
# Parameters and forward pass
# ---------------------------------------------------------------------------
def init_params(key):
    params = {}
    keys = jax.random.split(key, 16)
    k = iter(keys)
    params["proj0"] = jax.random.normal(
        next(k), (3, STAGE_CHANNELS[0]), jnp.float32) * (2.0 / 3) ** 0.5
    c_prev = STAGE_CHANNELS[0]
    for i, c in enumerate(STAGE_CHANNELS, start=1):
        params[f"proj{i}"] = jax.random.normal(
            next(k), (c_prev, c), jnp.float32) * (2.0 / c_prev) ** 0.5
        cmid = c // SE_REDUCTION
        # Synthetic PyTorch-layout SE weights (bias=False, as in the reference).
        w1 = jax.random.normal(next(k), (cmid, c), jnp.float32) * c ** -0.5
        w2 = jax.random.normal(next(k), (c, cmid), jnp.float32) * cmid ** -0.5
        w1p, w2p = _pack_se_weights(w1, w2)
        params[f"se{i}_w1p"] = w1p
        params[f"se{i}_w2p"] = w2p
        c_prev = c
    return params


def _forward(params, x_nchw, *, use_pallas):
    # PyTorch input is NCHW; convert to NHWC for the TPU-friendly layout.
    x = jnp.transpose(x_nchw, (0, 2, 3, 1)).astype(jnp.float32)
    # layer0: conv1/bn/relu/maxpool -> /4 spatial, lift to C1 (stand-in)
    x = _stage_standin(x, params["proj0"], n_down=2)

    pooled = None
    scale_c = None
    for i in range(1, 5):
        n_down = 0 if i == 1 else 1
        x = _stage_standin(x, params[f"proj{i}"], n_down=n_down, scale_c=scale_c)
        x = _distortion_attention_standin(x)

        B, H, W, C = x.shape
        sp = (H * W * C) // LANES
        inv_sp = 1.0 / float(sp)
        xp = _pack_lanes(x)                                    # (B, Sp, 128) bf16

        if use_pallas:
            sums = lane_sums(xp)
        else:  # pure-JAX reference path (same bf16 activations)
            sums = jnp.sum(xp.astype(jnp.float32), axis=1)

        w1p, w2p = params[f"se{i}_w1p"], params[f"se{i}_w2p"]
        if i < 4:
            if use_pallas:
                scale = se_head(sums, w1p, w2p, inv_sp)
            else:
                m = sums * inv_sp
                h = jnp.maximum(
                    jnp.dot(m, w1p, precision=jax.lax.Precision.HIGHEST), 0.0)
                scale = jax.nn.sigmoid(
                    jnp.dot(h, w2p, precision=jax.lax.Precision.HIGHEST))
            scale_c = scale[:, :C]       # lane l holds channel l % C
        else:
            if use_pallas:
                pooled = se4_head(sums, w1p, w2p, inv_sp)
            else:
                m = sums * inv_sp
                h = jnp.maximum(
                    jnp.dot(m, w1p, precision=jax.lax.Precision.HIGHEST), 0.0)
                z = jax.nn.sigmoid(
                    jnp.dot(h, w2p, precision=jax.lax.Precision.HIGHEST))
                pooled = m * (0.5 * (1.0 + z))

    # global_avg_pool((1,1)) + view(b, -1)  -> (B, C_last)
    return pooled


resnet_se_forward = jax.jit(functools.partial(_forward, use_pallas=True))
_reference_forward = jax.jit(functools.partial(_forward, use_pallas=False))


if __name__ == "__main__":
    key = jax.random.PRNGKey(0)
    pkey, xkey = jax.random.split(key)
    params = init_params(pkey)

    # Small input consistent with an NCHW image batch.
    x = jax.random.normal(xkey, (2, 3, 64, 64), jnp.float32)

    out = jax.block_until_ready(resnet_se_forward(params, x))
    ref = jax.block_until_ready(_reference_forward(params, x))

    assert out.shape == (2, STAGE_CHANNELS[-1]), out.shape
    assert bool(jnp.all(jnp.isfinite(out)))
    # Both paths stream identical bf16 activations; residual diff is f32
    # rounding of the Pallas reduce/FC vs XLA's.
    assert bool(jnp.allclose(out, ref, rtol=5e-2, atol=1e-3)), (
        float(jnp.max(jnp.abs(out - ref))))
    print("KERNEL_OK")
</pallas_src>

<mosaic_0001>
module attributes {stable_mosaic.version = 11 : i64} {
  func.func @_lane_sum_kernel(%arg0: i32, %arg1: i32, %arg2: memref<1x32x128xbf16, #tpu.memory_space<vmem>>, %arg3: memref<1x1x128xf32, #tpu.memory_space<vmem>>) attributes {dimension_semantics = [#tpu.dimension_semantics<parallel>, #tpu.dimension_semantics<arbitrary>], iteration_bounds = array<i64: 2, 1>, scalar_prefetch = 0 : i64, scratch_operands = 0 : i64, tpu.core_type = #tpu.core_type<tc>, window_params = [{transform_indices = @transform_0, window_bounds = array<i64: 1, 32, 128>}, {transform_indices = @transform_1, window_bounds = array<i64: 1, 1, 128>}]} {
    %c0_i32 = arith.constant 0 : i32
    %0 = arith.cmpi eq, %arg1, %c0_i32 : i32
    %1 = arith.extui %0 : i1 to i32
    %c0_i32_0 = arith.constant 0 : i32
    %2 = arith.cmpi ne, %1, %c0_i32_0 : i32
    scf.if %2 {
      %cst_9 = arith.constant 0.000000e+00 : f32
      %10 = vector.broadcast %cst_9 : f32 to vector<1x1x128xf32>
      %c0_10 = arith.constant 0 : index
      %c0_11 = arith.constant 0 : index
      %c0_12 = arith.constant 0 : index
      %11 = vector.load %arg3[%c0_10, %c0_11, %c0_12] : memref<1x1x128xf32, #tpu.memory_space<vmem>>, vector<1x1x128xf32>
      tpu.vector_store %arg3[%c0_10, %c0_11, %c0_12], %10 {strides = array<i32>} : memref<1x1x128xf32, #tpu.memory_space<vmem>>, vector<1x1x128xf32>,
    } else {
    }
    %c0 = arith.constant 0 : index
    %c0_1 = arith.constant 0 : index
    %c0_2 = arith.constant 0 : index
    %3 = vector.load %arg3[%c0, %c0_1, %c0_2] : memref<1x1x128xf32, #tpu.memory_space<vmem>>, vector<1x1x128xf32>
    %c0_3 = arith.constant 0 : index
    %c0_4 = arith.constant 0 : index
    %c0_5 = arith.constant 0 : index
    %4 = vector.load %arg2[%c0_3, %c0_4, %c0_5] : memref<1x32x128xbf16, #tpu.memory_space<vmem>>, vector<1x32x128xbf16>
    %5 = arith.extf %4 : vector<1x32x128xbf16> to vector<1x32x128xf32>
    %cst = arith.constant dense<0.000000e+00> : vector<1x128xf32>
    %6 = vector.multi_reduction <add>, %5, %cst [1] : vector<1x32x128xf32> to vector<1x128xf32>
    %7 = vector.shape_cast %6 : vector<1x128xf32> to vector<1x1x128xf32>
    %8 = arith.addf %3, %7 : vector<1x1x128xf32>
    %c0_6 = arith.constant 0 : index
    %c0_7 = arith.constant 0 : index
    %c0_8 = arith.constant 0 : index
    %9 = vector.load %arg3[%c0_6, %c0_7, %c0_8] : memref<1x1x128xf32, #tpu.memory_space<vmem>>, vector<1x1x128xf32>
    tpu.vector_store %arg3[%c0_6, %c0_7, %c0_8], %8 {strides = array<i32>} : memref<1x1x128xf32, #tpu.memory_space<vmem>>, vector<1x1x128xf32>,
    return
  }
  func.func @transform_0(%arg0: i32, %arg1: i32) -> (i32, i32, i32) {
    %c0_i32 = arith.constant 0 : i32
    %c0_i32_0 = arith.constant 0 : i32
    return %arg0, %arg1, %c0_i32 : i32, i32, i32
  }
  func.func @transform_1(%arg0: i32, %arg1: i32) -> (i32, i32, i32) {
    %c0_i32 = arith.constant 0 : i32
    %c0_i32_0 = arith.constant 0 : i32
    %c0_i32_1 = arith.constant 0 : i32
    return %arg0, %c0_i32, %c0_i32_0 : i32, i32, i32
  }
}

module attributes {stable_mosaic.version = 11 : i64} {
  func.func @_se_head_kernel(%arg0: memref<2x128xf32, #tpu.memory_space<vmem>>, %arg1: memref<128x128xf32, #tpu.memory_space<vmem>>, %arg2: memref<128x128xf32, #tpu.memory_space<vmem>>, %arg3: memref<2x128xf32, #tpu.memory_space<vmem>>) attributes {dimension_semantics = [], scalar_prefetch = 0 : i64, scratch_operands = 0 : i64, tpu.core_type = #tpu.core_type<tc>} {
    %c0 = arith.constant 0 : index
    %c0_0 = arith.constant 0 : index
    %0 = vector.load %arg0[%c0, %c0_0] : memref<2x128xf32, #tpu.memory_space<vmem>>, vector<2x128xf32>
    %cst = arith.constant 3.125000e-02 : f32
    %1 = vector.broadcast %cst : f32 to vector<2x128xf32>
    %2 = arith.mulf %0, %1 : vector<2x128xf32>
    %c0_1 = arith.constant 0 : index
    %c0_2 = arith.constant 0 : index
    %3 = vector.load %arg1[%c0_1, %c0_2] : memref<128x128xf32, #tpu.memory_space<vmem>>, vector<128x128xf32>
    %cst_3 = arith.constant dense<0.000000e+00> : vector<2x128xf32>
    %4 = tpu.matmul %2, %3, %cst_3 {dimension_numbers = #tpu.dot_dimension_numbers<[1], [0], [0], [1], [0, 0, 1, 1], [], []>} : vector<2x128xf32>, vector<128x128xf32>, vector<2x128xf32> -> vector<2x128xf32>
    %cst_4 = arith.constant 0.000000e+00 : f32
    %5 = vector.broadcast %cst_4 : f32 to vector<2x128xf32>
    %6 = arith.maximumf %4, %5 : vector<2x128xf32>
    %c0_5 = arith.constant 0 : index
    %c0_6 = arith.constant 0 : index
    %7 = vector.load %arg2[%c0_5, %c0_6] : memref<128x128xf32, #tpu.memory_space<vmem>>, vector<128x128xf32>
    %cst_7 = arith.constant dense<0.000000e+00> : vector<2x128xf32>
    %8 = tpu.matmul %6, %7, %cst_7 {dimension_numbers = #tpu.dot_dimension_numbers<[1], [0], [0], [1], [0, 0, 1, 1], [], []>} : vector<2x128xf32>, vector<128x128xf32>, vector<2x128xf32> -> vector<2x128xf32>
    %9 = arith.negf %8 : vector<2x128xf32>
    %10 = math.exp %9 : vector<2x128xf32>
    %cst_8 = arith.constant 1.000000e+00 : f32
    %11 = vector.broadcast %cst_8 : f32 to vector<2x128xf32>
    %12 = arith.addf %11, %10 : vector<2x128xf32>
    %13 = arith.divf %11, %12 : vector<2x128xf32>
    %c0_9 = arith.constant 0 : index
    %c0_10 = arith.constant 0 : index
    %14 = vector.load %arg3[%c0_9, %c0_10] : memref<2x128xf32, #tpu.memory_space<vmem>>, vector<2x128xf32>
    tpu.vector_store %arg3[%c0_9, %c0_10], %13 {strides = array<i32>} : memref<2x128xf32, #tpu.memory_space<vmem>>, vector<2x128xf32>,
    return
  }
}

module attributes {stable_mosaic.version = 11 : i64} {
  func.func @_lane_sum_kernel(%arg0: i32, %arg1: i32, %arg2: memref<1x16x128xbf16, #tpu.memory_space<vmem>>, %arg3: memref<1x1x128xf32, #tpu.memory_space<vmem>>) attributes {dimension_semantics = [#tpu.dimension_semantics<parallel>, #tpu.dimension_semantics<arbitrary>], iteration_bounds = array<i64: 2, 1>, scalar_prefetch = 0 : i64, scratch_operands = 0 : i64, tpu.core_type = #tpu.core_type<tc>, window_params = [{transform_indices = @transform_0, window_bounds = array<i64: 1, 16, 128>}, {transform_indices = @transform_1, window_bounds = array<i64: 1, 1, 128>}]} {
    %c0_i32 = arith.constant 0 : i32
    %0 = arith.cmpi eq, %arg1, %c0_i32 : i32
    %1 = arith.extui %0 : i1 to i32
    %c0_i32_0 = arith.constant 0 : i32
    %2 = arith.cmpi ne, %1, %c0_i32_0 : i32
    scf.if %2 {
      %cst_9 = arith.constant 0.000000e+00 : f32
      %10 = vector.broadcast %cst_9 : f32 to vector<1x1x128xf32>
      %c0_10 = arith.constant 0 : index
      %c0_11 = arith.constant 0 : index
      %c0_12 = arith.constant 0 : index
      %11 = vector.load %arg3[%c0_10, %c0_11, %c0_12] : memref<1x1x128xf32, #tpu.memory_space<vmem>>, vector<1x1x128xf32>
      tpu.vector_store %arg3[%c0_10, %c0_11, %c0_12], %10 {strides = array<i32>} : memref<1x1x128xf32, #tpu.memory_space<vmem>>, vector<1x1x128xf32>,
    } else {
    }
    %c0 = arith.constant 0 : index
    %c0_1 = arith.constant 0 : index
    %c0_2 = arith.constant 0 : index
    %3 = vector.load %arg3[%c0, %c0_1, %c0_2] : memref<1x1x128xf32, #tpu.memory_space<vmem>>, vector<1x1x128xf32>
    %c0_3 = arith.constant 0 : index
    %c0_4 = arith.constant 0 : index
    %c0_5 = arith.constant 0 : index
    %4 = vector.load %arg2[%c0_3, %c0_4, %c0_5] : memref<1x16x128xbf16, #tpu.memory_space<vmem>>, vector<1x16x128xbf16>
    %5 = arith.extf %4 : vector<1x16x128xbf16> to vector<1x16x128xf32>
    %cst = arith.constant dense<0.000000e+00> : vector<1x128xf32>
    %6 = vector.multi_reduction <add>, %5, %cst [1] : vector<1x16x128xf32> to vector<1x128xf32>
    %7 = vector.shape_cast %6 : vector<1x128xf32> to vector<1x1x128xf32>
    %8 = arith.addf %3, %7 : vector<1x1x128xf32>
    %c0_6 = arith.constant 0 : index
    %c0_7 = arith.constant 0 : index
    %c0_8 = arith.constant 0 : index
    %9 = vector.load %arg3[%c0_6, %c0_7, %c0_8] : memref<1x1x128xf32, #tpu.memory_space<vmem>>, vector<1x1x128xf32>
    tpu.vector_store %arg3[%c0_6, %c0_7, %c0_8], %8 {strides = array<i32>} : memref<1x1x128xf32, #tpu.memory_space<vmem>>, vector<1x1x128xf32>,
    return
  }
  func.func @transform_0(%arg0: i32, %arg1: i32) -> (i32, i32, i32) {
    %c0_i32 = arith.constant 0 : i32
    %c0_i32_0 = arith.constant 0 : i32
    return %arg0, %arg1, %c0_i32 : i32, i32, i32
  }
  func.func @transform_1(%arg0: i32, %arg1: i32) -> (i32, i32, i32) {
    %c0_i32 = arith.constant 0 : i32
    %c0_i32_0 = arith.constant 0 : i32
    %c0_i32_1 = arith.constant 0 : i32
    return %arg0, %c0_i32, %c0_i32_0 : i32, i32, i32
  }
}

module attributes {stable_mosaic.version = 11 : i64} {
  func.func @_se_head_kernel(%arg0: memref<2x128xf32, #tpu.memory_space<vmem>>, %arg1: memref<128x128xf32, #tpu.memory_space<vmem>>, %arg2: memref<128x128xf32, #tpu.memory_space<vmem>>, %arg3: memref<2x128xf32, #tpu.memory_space<vmem>>) attributes {dimension_semantics = [], scalar_prefetch = 0 : i64, scratch_operands = 0 : i64, tpu.core_type = #tpu.core_type<tc>} {
    %c0 = arith.constant 0 : index
    %c0_0 = arith.constant 0 : index
    %0 = vector.load %arg0[%c0, %c0_0] : memref<2x128xf32, #tpu.memory_space<vmem>>, vector<2x128xf32>
    %cst = arith.constant 6.250000e-02 : f32
    %1 = vector.broadcast %cst : f32 to vector<2x128xf32>
    %2 = arith.mulf %0, %1 : vector<2x128xf32>
    %c0_1 = arith.constant 0 : index
    %c0_2 = arith.constant 0 : index
    %3 = vector.load %arg1[%c0_1, %c0_2] : memref<128x128xf32, #tpu.memory_space<vmem>>, vector<128x128xf32>
    %cst_3 = arith.constant dense<0.000000e+00> : vector<2x128xf32>
    %4 = tpu.matmul %2, %3, %cst_3 {dimension_numbers = #tpu.dot_dimension_numbers<[1], [0], [0], [1], [0, 0, 1, 1], [], []>} : vector<2x128xf32>, vector<128x128xf32>, vector<2x128xf32> -> vector<2x128xf32>
    %cst_4 = arith.constant 0.000000e+00 : f32
    %5 = vector.broadcast %cst_4 : f32 to vector<2x128xf32>
    %6 = arith.maximumf %4, %5 : vector<2x128xf32>
    %c0_5 = arith.constant 0 : index
    %c0_6 = arith.constant 0 : index
    %7 = vector.load %arg2[%c0_5, %c0_6] : memref<128x128xf32, #tpu.memory_space<vmem>>, vector<128x128xf32>
    %cst_7 = arith.constant dense<0.000000e+00> : vector<2x128xf32>
    %8 = tpu.matmul %6, %7, %cst_7 {dimension_numbers = #tpu.dot_dimension_numbers<[1], [0], [0], [1], [0, 0, 1, 1], [], []>} : vector<2x128xf32>, vector<128x128xf32>, vector<2x128xf32> -> vector<2x128xf32>
    %9 = arith.negf %8 : vector<2x128xf32>
    %10 = math.exp %9 : vector<2x128xf32>
    %cst_8 = arith.constant 1.000000e+00 : f32
    %11 = vector.broadcast %cst_8 : f32 to vector<2x128xf32>
    %12 = arith.addf %11, %10 : vector<2x128xf32>
    %13 = arith.divf %11, %12 : vector<2x128xf32>
    %c0_9 = arith.constant 0 : index
    %c0_10 = arith.constant 0 : index
    %14 = vector.load %arg3[%c0_9, %c0_10] : memref<2x128xf32, #tpu.memory_space<vmem>>, vector<2x128xf32>
    tpu.vector_store %arg3[%c0_9, %c0_10], %13 {strides = array<i32>} : memref<2x128xf32, #tpu.memory_space<vmem>>, vector<2x128xf32>,
    return
  }
}

module attributes {stable_mosaic.version = 11 : i64} {
  func.func @_se_head_kernel(%arg0: memref<2x128xf32, #tpu.memory_space<vmem>>, %arg1: memref<128x128xf32, #tpu.memory_space<vmem>>, %arg2: memref<128x128xf32, #tpu.memory_space<vmem>>, %arg3: memref<2x128xf32, #tpu.memory_space<vmem>>) attributes {dimension_semantics = [], scalar_prefetch = 0 : i64, scratch_operands = 0 : i64, tpu.core_type = #tpu.core_type<tc>} {
    %c0 = arith.constant 0 : index
    %c0_0 = arith.constant 0 : index
    %0 = vector.load %arg0[%c0, %c0_0] : memref<2x128xf32, #tpu.memory_space<vmem>>, vector<2x128xf32>
    %cst = arith.constant 1.250000e-01 : f32
    %1 = vector.broadcast %cst : f32 to vector<2x128xf32>
    %2 = arith.mulf %0, %1 : vector<2x128xf32>
    %c0_1 = arith.constant 0 : index
    %c0_2 = arith.constant 0 : index
    %3 = vector.load %arg1[%c0_1, %c0_2] : memref<128x128xf32, #tpu.memory_space<vmem>>, vector<128x128xf32>
    %cst_3 = arith.constant dense<0.000000e+00> : vector<2x128xf32>
    %4 = tpu.matmul %2, %3, %cst_3 {dimension_numbers = #tpu.dot_dimension_numbers<[1], [0], [0], [1], [0, 0, 1, 1], [], []>} : vector<2x128xf32>, vector<128x128xf32>, vector<2x128xf32> -> vector<2x128xf32>
    %cst_4 = arith.constant 0.000000e+00 : f32
    %5 = vector.broadcast %cst_4 : f32 to vector<2x128xf32>
    %6 = arith.maximumf %4, %5 : vector<2x128xf32>
    %c0_5 = arith.constant 0 : index
    %c0_6 = arith.constant 0 : index
    %7 = vector.load %arg2[%c0_5, %c0_6] : memref<128x128xf32, #tpu.memory_space<vmem>>, vector<128x128xf32>
    %cst_7 = arith.constant dense<0.000000e+00> : vector<2x128xf32>
    %8 = tpu.matmul %6, %7, %cst_7 {dimension_numbers = #tpu.dot_dimension_numbers<[1], [0], [0], [1], [0, 0, 1, 1], [], []>} : vector<2x128xf32>, vector<128x128xf32>, vector<2x128xf32> -> vector<2x128xf32>
    %9 = arith.negf %8 : vector<2x128xf32>
    %10 = math.exp %9 : vector<2x128xf32>
    %cst_8 = arith.constant 1.000000e+00 : f32
    %11 = vector.broadcast %cst_8 : f32 to vector<2x128xf32>
    %12 = arith.addf %11, %10 : vector<2x128xf32>
    %13 = arith.divf %11, %12 : vector<2x128xf32>
    %c0_9 = arith.constant 0 : index
    %c0_10 = arith.constant 0 : index
    %14 = vector.load %arg3[%c0_9, %c0_10] : memref<2x128xf32, #tpu.memory_space<vmem>>, vector<2x128xf32>
    tpu.vector_store %arg3[%c0_9, %c0_10], %13 {strides = array<i32>} : memref<2x128xf32, #tpu.memory_space<vmem>>, vector<2x128xf32>,
    return
  }
}

module attributes {stable_mosaic.version = 11 : i64} {
  func.func @_lane_sum_kernel(%arg0: i32, %arg1: i32, %arg2: memref<1x8x128xbf16, #tpu.memory_space<vmem>>, %arg3: memref<1x1x128xf32, #tpu.memory_space<vmem>>) attributes {dimension_semantics = [#tpu.dimension_semantics<parallel>, #tpu.dimension_semantics<arbitrary>], iteration_bounds = array<i64: 2, 1>, scalar_prefetch = 0 : i64, scratch_operands = 0 : i64, tpu.core_type = #tpu.core_type<tc>, window_params = [{transform_indices = @transform_0, window_bounds = array<i64: 1, 8, 128>}, {transform_indices = @transform_1, window_bounds = array<i64: 1, 1, 128>}]} {
    %c0_i32 = arith.constant 0 : i32
    %0 = arith.cmpi eq, %arg1, %c0_i32 : i32
    %1 = arith.extui %0 : i1 to i32
    %c0_i32_0 = arith.constant 0 : i32
    %2 = arith.cmpi ne, %1, %c0_i32_0 : i32
    scf.if %2 {
      %cst_9 = arith.constant 0.000000e+00 : f32
      %10 = vector.broadcast %cst_9 : f32 to vector<1x1x128xf32>
      %c0_10 = arith.constant 0 : index
      %c0_11 = arith.constant 0 : index
      %c0_12 = arith.constant 0 : index
      %11 = vector.load %arg3[%c0_10, %c0_11, %c0_12] : memref<1x1x128xf32, #tpu.memory_space<vmem>>, vector<1x1x128xf32>
      tpu.vector_store %arg3[%c0_10, %c0_11, %c0_12], %10 {strides = array<i32>} : memref<1x1x128xf32, #tpu.memory_space<vmem>>, vector<1x1x128xf32>,
    } else {
    }
    %c0 = arith.constant 0 : index
    %c0_1 = arith.constant 0 : index
    %c0_2 = arith.constant 0 : index
    %3 = vector.load %arg3[%c0, %c0_1, %c0_2] : memref<1x1x128xf32, #tpu.memory_space<vmem>>, vector<1x1x128xf32>
    %c0_3 = arith.constant 0 : index
    %c0_4 = arith.constant 0 : index
    %c0_5 = arith.constant 0 : index
    %4 = vector.load %arg2[%c0_3, %c0_4, %c0_5] : memref<1x8x128xbf16, #tpu.memory_space<vmem>>, vector<1x8x128xbf16>
    %5 = arith.extf %4 : vector<1x8x128xbf16> to vector<1x8x128xf32>
    %cst = arith.constant dense<0.000000e+00> : vector<1x128xf32>
    %6 = vector.multi_reduction <add>, %5, %cst [1] : vector<1x8x128xf32> to vector<1x128xf32>
    %7 = vector.shape_cast %6 : vector<1x128xf32> to vector<1x1x128xf32>
    %8 = arith.addf %3, %7 : vector<1x1x128xf32>
    %c0_6 = arith.constant 0 : index
    %c0_7 = arith.constant 0 : index
    %c0_8 = arith.constant 0 : index
    %9 = vector.load %arg3[%c0_6, %c0_7, %c0_8] : memref<1x1x128xf32, #tpu.memory_space<vmem>>, vector<1x1x128xf32>
    tpu.vector_store %arg3[%c0_6, %c0_7, %c0_8], %8 {strides = array<i32>} : memref<1x1x128xf32, #tpu.memory_space<vmem>>, vector<1x1x128xf32>,
    return
  }
  func.func @transform_0(%arg0: i32, %arg1: i32) -> (i32, i32, i32) {
    %c0_i32 = arith.constant 0 : i32
    %c0_i32_0 = arith.constant 0 : i32
    return %arg0, %arg1, %c0_i32 : i32, i32, i32
  }
  func.func @transform_1(%arg0: i32, %arg1: i32) -> (i32, i32, i32) {
    %c0_i32 = arith.constant 0 : i32
    %c0_i32_0 = arith.constant 0 : i32
    %c0_i32_1 = arith.constant 0 : i32
    return %arg0, %c0_i32, %c0_i32_0 : i32, i32, i32
  }
}

module attributes {stable_mosaic.version = 11 : i64} {
  func.func @_lane_sum_kernel(%arg0: i32, %arg1: i32, %arg2: memref<1x4x128xbf16, #tpu.memory_space<vmem>>, %arg3: memref<1x1x128xf32, #tpu.memory_space<vmem>>) attributes {dimension_semantics = [#tpu.dimension_semantics<parallel>, #tpu.dimension_semantics<arbitrary>], iteration_bounds = array<i64: 2, 1>, scalar_prefetch = 0 : i64, scratch_operands = 0 : i64, tpu.core_type = #tpu.core_type<tc>, window_params = [{transform_indices = @transform_0, window_bounds = array<i64: 1, 4, 128>}, {transform_indices = @transform_1, window_bounds = array<i64: 1, 1, 128>}]} {
    %c0_i32 = arith.constant 0 : i32
    %0 = arith.cmpi eq, %arg1, %c0_i32 : i32
    %1 = arith.extui %0 : i1 to i32
    %c0_i32_0 = arith.constant 0 : i32
    %2 = arith.cmpi ne, %1, %c0_i32_0 : i32
    scf.if %2 {
      %cst_9 = arith.constant 0.000000e+00 : f32
      %10 = vector.broadcast %cst_9 : f32 to vector<1x1x128xf32>
      %c0_10 = arith.constant 0 : index
      %c0_11 = arith.constant 0 : index
      %c0_12 = arith.constant 0 : index
      %11 = vector.load %arg3[%c0_10, %c0_11, %c0_12] : memref<1x1x128xf32, #tpu.memory_space<vmem>>, vector<1x1x128xf32>
      tpu.vector_store %arg3[%c0_10, %c0_11, %c0_12], %10 {strides = array<i32>} : memref<1x1x128xf32, #tpu.memory_space<vmem>>, vector<1x1x128xf32>,
    } else {
    }
    %c0 = arith.constant 0 : index
    %c0_1 = arith.constant 0 : index
    %c0_2 = arith.constant 0 : index
    %3 = vector.load %arg3[%c0, %c0_1, %c0_2] : memref<1x1x128xf32, #tpu.memory_space<vmem>>, vector<1x1x128xf32>
    %c0_3 = arith.constant 0 : index
    %c0_4 = arith.constant 0 : index
    %c0_5 = arith.constant 0 : index
    %4 = vector.load %arg2[%c0_3, %c0_4, %c0_5] : memref<1x4x128xbf16, #tpu.memory_space<vmem>>, vector<1x4x128xbf16>
    %5 = arith.extf %4 : vector<1x4x128xbf16> to vector<1x4x128xf32>
    %cst = arith.constant dense<0.000000e+00> : vector<1x128xf32>
    %6 = vector.multi_reduction <add>, %5, %cst [1] : vector<1x4x128xf32> to vector<1x128xf32>
    %7 = vector.shape_cast %6 : vector<1x128xf32> to vector<1x1x128xf32>
    %8 = arith.addf %3, %7 : vector<1x1x128xf32>
    %c0_6 = arith.constant 0 : index
    %c0_7 = arith.constant 0 : index
    %c0_8 = arith.constant 0 : index
    %9 = vector.load %arg3[%c0_6, %c0_7, %c0_8] : memref<1x1x128xf32, #tpu.memory_space<vmem>>, vector<1x1x128xf32>
    tpu.vector_store %arg3[%c0_6, %c0_7, %c0_8], %8 {strides = array<i32>} : memref<1x1x128xf32, #tpu.memory_space<vmem>>, vector<1x1x128xf32>,
    return
  }
  func.func @transform_0(%arg0: i32, %arg1: i32) -> (i32, i32, i32) {
    %c0_i32 = arith.constant 0 : i32
    %c0_i32_0 = arith.constant 0 : i32
    return %arg0, %arg1, %c0_i32 : i32, i32, i32
  }
  func.func @transform_1(%arg0: i32, %arg1: i32) -> (i32, i32, i32) {
    %c0_i32 = arith.constant 0 : i32
    %c0_i32_0 = arith.constant 0 : i32
    %c0_i32_1 = arith.constant 0 : i32
    return %arg0, %c0_i32, %c0_i32_0 : i32, i32, i32
  }
}

module attributes {stable_mosaic.version = 11 : i64} {
  func.func @_se4_head_kernel(%arg0: memref<2x128xf32, #tpu.memory_space<vmem>>, %arg1: memref<128x128xf32, #tpu.memory_space<vmem>>, %arg2: memref<128x128xf32, #tpu.memory_space<vmem>>, %arg3: memref<2x128xf32, #tpu.memory_space<vmem>>) attributes {dimension_semantics = [], scalar_prefetch = 0 : i64, scratch_operands = 0 : i64, tpu.core_type = #tpu.core_type<tc>} {
    %c0 = arith.constant 0 : index
    %c0_0 = arith.constant 0 : index
    %0 = vector.load %arg0[%c0, %c0_0] : memref<2x128xf32, #tpu.memory_space<vmem>>, vector<2x128xf32>
    %cst = arith.constant 2.500000e-01 : f32
    %1 = vector.broadcast %cst : f32 to vector<2x128xf32>
    %2 = arith.mulf %0, %1 : vector<2x128xf32>
    %c0_1 = arith.constant 0 : index
    %c0_2 = arith.constant 0 : index
    %3 = vector.load %arg1[%c0_1, %c0_2] : memref<128x128xf32, #tpu.memory_space<vmem>>, vector<128x128xf32>
    %cst_3 = arith.constant dense<0.000000e+00> : vector<2x128xf32>
    %4 = tpu.matmul %2, %3, %cst_3 {dimension_numbers = #tpu.dot_dimension_numbers<[1], [0], [0], [1], [0, 0, 1, 1], [], []>} : vector<2x128xf32>, vector<128x128xf32>, vector<2x128xf32> -> vector<2x128xf32>
    %cst_4 = arith.constant 0.000000e+00 : f32
    %5 = vector.broadcast %cst_4 : f32 to vector<2x128xf32>
    %6 = arith.maximumf %4, %5 : vector<2x128xf32>
    %c0_5 = arith.constant 0 : index
    %c0_6 = arith.constant 0 : index
    %7 = vector.load %arg2[%c0_5, %c0_6] : memref<128x128xf32, #tpu.memory_space<vmem>>, vector<128x128xf32>
    %cst_7 = arith.constant dense<0.000000e+00> : vector<2x128xf32>
    %8 = tpu.matmul %6, %7, %cst_7 {dimension_numbers = #tpu.dot_dimension_numbers<[1], [0], [0], [1], [0, 0, 1, 1], [], []>} : vector<2x128xf32>, vector<128x128xf32>, vector<2x128xf32> -> vector<2x128xf32>
    %9 = arith.negf %8 : vector<2x128xf32>
    %10 = math.exp %9 : vector<2x128xf32>
    %cst_8 = arith.constant 1.000000e+00 : f32
    %11 = vector.broadcast %cst_8 : f32 to vector<2x128xf32>
    %12 = arith.addf %11, %10 : vector<2x128xf32>
    %13 = arith.divf %11, %12 : vector<2x128xf32>
    %cst_9 = arith.constant 1.000000e+00 : f32
    %14 = vector.broadcast %cst_9 : f32 to vector<2x128xf32>
    %15 = arith.addf %14, %13 : vector<2x128xf32>
    %cst_10 = arith.constant 5.000000e-01 : f32
    %16 = vector.broadcast %cst_10 : f32 to vector<2x128xf32>
    %17 = arith.mulf %16, %15 : vector<2x128xf32>
    %18 = arith.mulf %2, %17 : vector<2x128xf32>
    %c0_11 = arith.constant 0 : index
    %c0_12 = arith.constant 0 : index
    %19 = vector.load %arg3[%c0_11, %c0_12] : memref<2x128xf32, #tpu.memory_space<vmem>>, vector<2x128xf32>
    tpu.vector_store %arg3[%c0_11, %c0_12], %18 {strides = array<i32>} : memref<2x128xf32, #tpu.memory_space<vmem>>, vector<2x128xf32>,
    return
  }
}

</mosaic_0001>

<bundles_post_ra>
// kernel: _forward.8
= control target key start
LH: loop header
LB: loop body
LE: loop exit
PB: predicated region body
PF: predicated region fallthrough
CT: control target
= control target key end

     0   :  { %s306_s6 = smov 0   ;;  %s308_s7 = smov 0   ;;  %s339_s0 = inlined_call_operand.vmem [shape: bf16[2,32,128], index: 0, kind: input, shape index: {}]   ;;  %s340_s1 = inlined_call_operand.vmem [shape: f32[2,1,128], index: 1, kind: output, shape index: {}]  }
   0x1   :  { %s310_s8 = smov 0  }
   0x2 LB: > { %s23_s9 = sadd.s32 1, %s289_s7  ;;  %p231_p0 = scmp.ge.s32.totalorder %s293_s8, 1  ;;  %s293_s8 = sphi %s310_s8, %s11_s8   ;;  %s289_s7 = sphi %s308_s7, %s342_s7   ;;  %s285_s6 = sphi %s306_s6, %s341_s6  }
   0x3   : > { %p25_p1 = scmp.ge.s32.totalorder %s23_s9, 2  ;;  %p106_p2 = scmp.lt.s32.totalorder %s293_s8, 3 }
   0x5   : > { %s344_s9 = smov (%p25_p1, %s23_s9), 0  ;;  %p107_p3 = pnand %p231_p0, %p106_p2 }
   0x6   : > { %p129_p4 = scmp.lt.s32.totalorder (!%p107_p3), %s285_s6, 1 }
   0x7   : > { %110 = sbr.rel (%p107_p3) target bundleno = 39 (0x27), region = 24 }
   0xc   : > { %s346_s6 = smov (!%p129_p4, %s285_s6), 1  ;;  %v295_v0 = vmov 0.0  }
   0xd   : > { %s236_s10 = sshll.u32 %s346_s6, 4  ;;  %s140_s13 = scalar_lea.vmem %s340_s1, %s346_s6 }
   0xe   : > { %s136_s16 = scalar_lea.vmem %s339_s0, %s236_s10  ;;  %145 = vst [vmem:[%s140_s13] sm:$0x1] %v295_v0 }
   0xf   : > { %v238_v1 = vld [vmem:[%s136_s16] sm:$0xff]   ;;  %v245_v2 = vld [vmem:[%s136_s16 + $0x8] sm:$0xff]  }
  0x10   : > { %v239_v3 = vunpack.c.l.bf16 %v238_v1  ;;  %v240_v4 = vunpack.c.h.bf16 %v238_v1  ;;  %v243_v5 = vunpack.c.l.bf16 %v245_v2  ;;  %v244_v6 = vunpack.c.h.bf16 %v245_v2 }
  0x12   : > { %v155_v7 = vadd.f32 %v240_v4, %v239_v3 }
  0x14   : > { %v156_v8 = vadd.f32 %v243_v5, %v155_v7 }
  0x15   : > { %v146_v15 = vld [vmem:[%s140_s13] sm:$0x1] }
  0x16   : > { %v157_v9 = vadd.f32 %v244_v6, %v156_v8 }
  0x18   : > { %v158_v10 = vrot.slane %v157_v9, 4 }
  0x1a   : > { %v159_v11 = vadd.f32 %v158_v10, %v157_v9 }
  0x1c   : > { %v160_v12 = vrot.slane %v159_v11, 2 }
  0x1e   : > { %v161_v13 = vadd.f32 %v160_v12, %v159_v11 }
  0x20   : > { %v162_v14 = vrot.slane %v161_v13, 1 }
  0x22   : > { %v163_v16 = vadd.f32 %v162_v14, %v161_v13 }
  0x24   : > { %v164_v17 = vadd.f32 %v163_v16, %v146_v15 }
  0x26   : > { %165 = vst [vmem:[%s140_s13] sm:$0x1] %v164_v17 }
  0x27 PF: > { %s11_s8 = sadd.s32 1, %s293_s8   ;;  %s341_s6 = smov %s289_s7 }
  0x28   : > { %p8_p5 = scmp.ge.s32.totalorder %s11_s8, 4   ;;  %s342_s7 = smov %s344_s9 }
  0x2a   :  { %10 = sbr.rel (!%p8_p5) target bundleno = 2 (0x2), region = 58 }

// kernel: _forward.9
= control target key start
LH: loop header
LB: loop body
LE: loop exit
PB: predicated region body
PF: predicated region fallthrough
CT: control target
= control target key end

     0   :  { %v311_v0 = vmov 0.0   ;;  %vm312_vm0 = vmmov 0   ;;  %s469_s1 = inlined_call_operand.vmem [shape: f32[128,128], index: 1, kind: input, shape index: {}]   ;;  %s470_s2 = inlined_call_operand.vmem [shape: f32[128,128], index: 2, kind: input, shape index: {}]   ;;  %s471_s0 = inlined_call_operand.vmem [shape: f32[2,128], index: 0, kind: input, shape index: {}]   ;;  %s472_s3 = inlined_call_operand.vmem [shape: f32[2,128], index: 3, kind: output, shape index: {}]  }
   0x1   :  { %235 = vmatprep.subr.mxu0 %v311_v0  ;;  %v31_v1 = vld [vmem:[%s469_s1 + $0x78] sm:$0xff]  ;;  %v30_v2 = vld [vmem:[%s469_s1 + $0x70] sm:$0xff]  ;;  %267 = vmatprep.mubr.msk.f32.mxu0 %vm312_vm0, %v311_v0  ;;  %v29_v3 = vld [vmem:[%s469_s1 + $0x68] sm:$0xff] }
   0x2   :  { %236 = vmatpush3.msra.mxu0 %v31_v1  ;;  %270 = vmatprep.subr.mxu1 %v311_v0  ;;  %v28_v4 = vld [vmem:[%s469_s1 + $0x60] sm:$0xff]  ;;  %v118_v5 = vld [vmem:[%s470_s2 + $0x78] sm:$0xff]  ;;  %v117_v7 = vld [vmem:[%s470_s2 + $0x70] sm:$0xff] }
   0x3   :  { %237 = vmatprep.subr.mxu0 %v311_v0  ;;  %302 = vmatprep.mubr.msk.f32.mxu1 %vm312_vm0, %v311_v0  ;;  %v27_v6 = vld [vmem:[%s469_s1 + $0x58] sm:$0xff]  ;;  %v116_v8 = vld [vmem:[%s470_s2 + $0x68] sm:$0xff]  ;;  %v26_v9 = vld [vmem:[%s469_s1 + $0x50] sm:$0xff] }
   0x4   :  { %238 = vmatpush3.msra.mxu0 %v30_v2  ;;  %271 = vmatpush3.msra.mxu1 %v118_v5  ;;  %v115_v10 = vld [vmem:[%s470_s2 + $0x60] sm:$0xff]  ;;  %v25_v11 = vld [vmem:[%s469_s1 + $0x48] sm:$0xff]  ;;  %v114_v12 = vld [vmem:[%s470_s2 + $0x58] sm:$0xff] }
   0x5   :  { %239 = vmatprep.subr.mxu0 %v311_v0  ;;  %272 = vmatprep.subr.mxu1 %v311_v0  ;;  %v24_v13 = vld [vmem:[%s469_s1 + $0x40] sm:$0xff]  ;;  %v113_v14 = vld [vmem:[%s470_s2 + $0x50] sm:$0xff]  ;;  %v23_v15 = vld [vmem:[%s469_s1 + $0x38] sm:$0xff] }
   0x6   :  { %240 = vmatpush3.msra.mxu0 %v29_v3  ;;  %273 = vmatpush3.msra.mxu1 %v117_v7  ;;  %v112_v16 = vld [vmem:[%s470_s2 + $0x48] sm:$0xff]  ;;  %v22_v17 = vld [vmem:[%s469_s1 + $0x30] sm:$0xff]  ;;  %v111_v18 = vld [vmem:[%s470_s2 + $0x40] sm:$0xff] }
   0x7   :  { %241 = vmatprep.subr.mxu0 %v311_v0  ;;  %274 = vmatprep.subr.mxu1 %v311_v0  ;;  %v21_v19 = vld [vmem:[%s469_s1 + $0x28] sm:$0xff]  ;;  %v110_v20 = vld [vmem:[%s470_s2 + $0x38] sm:$0xff]  ;;  %v20_v21 = vld [vmem:[%s469_s1 + $0x20] sm:$0xff] }
   0x8   :  { %242 = vmatpush3.msra.mxu0 %v28_v4  ;;  %275 = vmatpush3.msra.mxu1 %v116_v8  ;;  %v109_v22 = vld [vmem:[%s470_s2 + $0x30] sm:$0xff]  ;;  %v19_v23 = vld [vmem:[%s469_s1 + $0x18] sm:$0xff]  ;;  %v108_v24 = vld [vmem:[%s470_s2 + $0x28] sm:$0xff] }
   0x9   :  { %243 = vmatprep.subr.mxu0 %v311_v0  ;;  %276 = vmatprep.subr.mxu1 %v311_v0  ;;  %v18_v25 = vld [vmem:[%s469_s1 + $0x10] sm:$0xff]  ;;  %v14_v26 = vld [vmem:[%s471_s0] sm:$0x3]  ;;  %v17_v28 = vld [vmem:[%s469_s1 + $0x8] sm:$0xff] }
   0xa   :  { %244 = vmatpush3.msra.mxu0 %v27_v6  ;;  %277 = vmatpush3.msra.mxu1 %v115_v10  ;;  %v107_v27 = vld [vmem:[%s470_s2 + $0x20] sm:$0xff]  ;;  %v106_v29 = vld [vmem:[%s470_s2 + $0x18] sm:$0xff]  ;;  %v15_v31 = vmul.f32 0.03125, %v14_v26  ;;  %v105_v32 = vld [vmem:[%s470_s2 + $0x10] sm:$0xff] }
   0xb   :  { %245 = vmatprep.subr.mxu0 %v311_v0  ;;  %278 = vmatprep.subr.mxu1 %v311_v0  ;;  %v16_v30 = vld [vmem:[%s469_s1] sm:$0xff]  ;;  %v104_v33 = vld [vmem:[%s470_s2 + $0x8] sm:$0xff] }
   0xc   :  { %246 = vmatpush3.msra.mxu0 %v26_v9  ;;  %279 = vmatpush3.msra.mxu1 %v114_v12  ;;  %v103_v34 = vld [vmem:[%s470_s2] sm:$0xff] }
   0xd   :  { %247 = vmatprep.subr.mxu0 %v311_v0  ;;  %280 = vmatprep.subr.mxu1 %v311_v0 }
   0xe   :  { %248 = vmatpush3.msra.mxu0 %v25_v11  ;;  %281 = vmatpush3.msra.mxu1 %v113_v14 }
   0xf   :  { %249 = vmatprep.subr.mxu0 %v311_v0  ;;  %282 = vmatprep.subr.mxu1 %v311_v0 }
  0x10   :  { %250 = vmatpush3.msra.mxu0 %v24_v13  ;;  %283 = vmatpush3.msra.mxu1 %v112_v16 }
  0x11   :  { %251 = vmatprep.subr.mxu0 %v311_v0  ;;  %284 = vmatprep.subr.mxu1 %v311_v0 }
  0x12   :  { %252 = vmatpush3.msra.mxu0 %v23_v15  ;;  %285 = vmatpush3.msra.mxu1 %v111_v18 }
  0x13   :  { %253 = vmatprep.subr.mxu0 %v311_v0  ;;  %286 = vmatprep.subr.mxu1 %v311_v0 }
  0x14   :  { %254 = vmatpush3.msra.mxu0 %v22_v17  ;;  %287 = vmatpush3.msra.mxu1 %v110_v20 }
  0x15   :  { %255 = vmatprep.subr.mxu0 %v311_v0  ;;  %288 = vmatprep.subr.mxu1 %v311_v0 }
  0x16   :  { %256 = vmatpush3.msra.mxu0 %v21_v19  ;;  %289 = vmatpush3.msra.mxu1 %v109_v22 }
  0x17   :  { %257 = vmatprep.subr.mxu0 %v311_v0  ;;  %290 = vmatprep.subr.mxu1 %v311_v0 }
  0x18   :  { %258 = vmatpush3.msra.mxu0 %v20_v21  ;;  %291 = vmatpush3.msra.mxu1 %v108_v24 }
  0x19   :  { %259 = vmatprep.subr.mxu0 %v311_v0  ;;  %292 = vmatprep.subr.mxu1 %v311_v0 }
  0x1a   :  { %260 = vmatpush3.msra.mxu0 %v19_v23  ;;  %293 = vmatpush3.msra.mxu1 %v107_v27 }
  0x1b   :  { %261 = vmatprep.subr.mxu0 %v311_v0  ;;  %294 = vmatprep.subr.mxu1 %v311_v0 }
  0x1c   :  { %262 = vmatpush3.msra.mxu0 %v18_v25  ;;  %295 = vmatpush3.msra.mxu1 %v106_v29 }
  0x1d   :  { %263 = vmatprep.subr.mxu0 %v311_v0  ;;  %296 = vmatprep.subr.mxu1 %v311_v0 }
  0x1e   :  { %264 = vmatpush3.msra.mxu0 %v17_v28  ;;  %297 = vmatpush3.msra.mxu1 %v105_v32 }
  0x1f   :  { %265 = vmatprep.subr.mxu0 %v311_v0  ;;  %298 = vmatprep.subr.mxu1 %v311_v0 }
  0x20   :  { %266 = vmatpush3.msra.mxu0 %v16_v30  ;;  %299 = vmatpush3.msra.mxu1 %v104_v33 }
  0x21   :  { %268 = vmatmul.mubr.f32.vlgmr.msra.gmra.mxu0 %v15_v31  ;;  %300 = vmatprep.subr.mxu1 %v311_v0 }
  0x22   :  { %301 = vmatpush3.msra.mxu1 %v103_v34 }
  0xe1   :  { %v98_v35 = vpop.f32.mrf.mxu0 }
  0xe2   :  { %v102_v36 = vmax.f32 %v98_v35, 0.0 }
  0xe3   :  { %v269_v37 = vpop.f32.mrf.mxu0 }
  0xe4   :  { %303 = vmatmul.mubr.f32.vlgmr.msra.gmra.mxu1 %v102_v36 }
 0x1a4   :  { %v185_v38 = vpop.f32.mrf.mxu1 }
 0x1a5   :  { %v200_v39 = vmul.f32 -1.442695, %v185_v38 }
 0x1a6   :  { %v304_v40 = vpop.f32.mrf.mxu1 }
 0x1a7   :  { %307 = vpow2.f32 %v200_v39 }
 0x1b4   :  { %v308_v41 = vpop.eup %307 }
 0x1b5   :  { %v192_v42 = vadd.f32 1.0, %v308_v41 }
 0x1b7   :  { %309 = vrcp.f32 %v192_v42 }
 0x1c4   :  { %v310_v43 = vpop.eup %309 }
 0x1c5   :  { %195 = vst [vmem:[%s472_s3] sm:$0x3] %v310_v43 }

// kernel: _forward.10
= control target key start
LH: loop header
LB: loop body
LE: loop exit
PB: predicated region body
PF: predicated region fallthrough
CT: control target
= control target key end

     0   :  { %s295_s6 = smov 0   ;;  %s297_s7 = smov 0   ;;  %s325_s0 = inlined_call_operand.vmem [shape: bf16[2,16,128], index: 0, kind: input, shape index: {}]   ;;  %s326_s1 = inlined_call_operand.vmem [shape: f32[2,1,128], index: 1, kind: output, shape index: {}]  }
   0x1   :  { %s299_s8 = smov 0  }
   0x2 LB: > { %s23_s9 = sadd.s32 1, %s278_s7  ;;  %p225_p0 = scmp.ge.s32.totalorder %s282_s8, 1  ;;  %s282_s8 = sphi %s299_s8, %s11_s8   ;;  %s278_s7 = sphi %s297_s7, %s328_s7   ;;  %s274_s6 = sphi %s295_s6, %s327_s6  }
   0x3   : > { %p25_p1 = scmp.ge.s32.totalorder %s23_s9, 2  ;;  %p106_p2 = scmp.lt.s32.totalorder %s282_s8, 3 }
   0x5   : > { %s330_s9 = smov (%p25_p1, %s23_s9), 0  ;;  %p107_p3 = pnand %p225_p0, %p106_p2 }
   0x6   : > { %p129_p4 = scmp.lt.s32.totalorder (!%p107_p3), %s274_s6, 1 }
   0x7   : > { %110 = sbr.rel (%p107_p3) target bundleno = 35 (0x23), region = 24 }
   0xc   : > { %s332_s6 = smov (!%p129_p4, %s274_s6), 1  ;;  %v284_v0 = vmov 0.0  }
   0xd   : > { %s230_s10 = sshll.u32 %s332_s6, 3  ;;  %s140_s13 = scalar_lea.vmem %s326_s1, %s332_s6 }
   0xe   : > { %s136_s16 = scalar_lea.vmem %s325_s0, %s230_s10  ;;  %145 = vst [vmem:[%s140_s13] sm:$0x1] %v284_v0 }
   0xf   : > { %v232_v1 = vld [vmem:[%s136_s16] sm:$0xff]  }
  0x10   : > { %v233_v2 = vunpack.c.l.bf16 %v232_v1  ;;  %v234_v3 = vunpack.c.h.bf16 %v232_v1 }
  0x12   : > { %v151_v4 = vadd.f32 %v234_v3, %v233_v2 }
  0x14   : > { %v152_v5 = vrot.slane %v151_v4, 4 }
  0x15   : > { %v146_v10 = vld [vmem:[%s140_s13] sm:$0x1] }
  0x16   : > { %v153_v6 = vadd.f32 %v152_v5, %v151_v4 }
  0x18   : > { %v154_v7 = vrot.slane %v153_v6, 2 }
  0x1a   : > { %v155_v8 = vadd.f32 %v154_v7, %v153_v6 }
  0x1c   : > { %v156_v9 = vrot.slane %v155_v8, 1 }
  0x1e   : > { %v157_v11 = vadd.f32 %v156_v9, %v155_v8 }
  0x20   : > { %v158_v12 = vadd.f32 %v157_v11, %v146_v10 }
  0x22   : > { %159 = vst [vmem:[%s140_s13] sm:$0x1] %v158_v12 }
  0x23 PF: > { %s11_s8 = sadd.s32 1, %s282_s8   ;;  %s327_s6 = smov %s278_s7 }
  0x24   : > { %p8_p5 = scmp.ge.s32.totalorder %s11_s8, 4   ;;  %s328_s7 = smov %s330_s9 }
  0x26   :  { %10 = sbr.rel (!%p8_p5) target bundleno = 2 (0x2), region = 58 }

// kernel: _forward.11
= control target key start
LH: loop header
LB: loop body
LE: loop exit
PB: predicated region body
PF: predicated region fallthrough
CT: control target
= control target key end

     0   :  { %v311_v0 = vmov 0.0   ;;  %vm312_vm0 = vmmov 0   ;;  %s469_s1 = inlined_call_operand.vmem [shape: f32[128,128], index: 1, kind: input, shape index: {}]   ;;  %s470_s2 = inlined_call_operand.vmem [shape: f32[128,128], index: 2, kind: input, shape index: {}]   ;;  %s471_s0 = inlined_call_operand.vmem [shape: f32[2,128], index: 0, kind: input, shape index: {}]   ;;  %s472_s3 = inlined_call_operand.vmem [shape: f32[2,128], index: 3, kind: output, shape index: {}]  }
   0x1   :  { %235 = vmatprep.subr.mxu0 %v311_v0  ;;  %v31_v1 = vld [vmem:[%s469_s1 + $0x78] sm:$0xff]  ;;  %v30_v2 = vld [vmem:[%s469_s1 + $0x70] sm:$0xff]  ;;  %267 = vmatprep.mubr.msk.f32.mxu0 %vm312_vm0, %v311_v0  ;;  %v29_v3 = vld [vmem:[%s469_s1 + $0x68] sm:$0xff] }
   0x2   :  { %236 = vmatpush3.msra.mxu0 %v31_v1  ;;  %270 = vmatprep.subr.mxu1 %v311_v0  ;;  %v28_v4 = vld [vmem:[%s469_s1 + $0x60] sm:$0xff]  ;;  %v118_v5 = vld [vmem:[%s470_s2 + $0x78] sm:$0xff]  ;;  %v117_v7 = vld [vmem:[%s470_s2 + $0x70] sm:$0xff] }
   0x3   :  { %237 = vmatprep.subr.mxu0 %v311_v0  ;;  %302 = vmatprep.mubr.msk.f32.mxu1 %vm312_vm0, %v311_v0  ;;  %v27_v6 = vld [vmem:[%s469_s1 + $0x58] sm:$0xff]  ;;  %v116_v8 = vld [vmem:[%s470_s2 + $0x68] sm:$0xff]  ;;  %v26_v9 = vld [vmem:[%s469_s1 + $0x50] sm:$0xff] }
   0x4   :  { %238 = vmatpush3.msra.mxu0 %v30_v2  ;;  %271 = vmatpush3.msra.mxu1 %v118_v5  ;;  %v115_v10 = vld [vmem:[%s470_s2 + $0x60] sm:$0xff]  ;;  %v25_v11 = vld [vmem:[%s469_s1 + $0x48] sm:$0xff]  ;;  %v114_v12 = vld [vmem:[%s470_s2 + $0x58] sm:$0xff] }
   0x5   :  { %239 = vmatprep.subr.mxu0 %v311_v0  ;;  %272 = vmatprep.subr.mxu1 %v311_v0  ;;  %v24_v13 = vld [vmem:[%s469_s1 + $0x40] sm:$0xff]  ;;  %v113_v14 = vld [vmem:[%s470_s2 + $0x50] sm:$0xff]  ;;  %v23_v15 = vld [vmem:[%s469_s1 + $0x38] sm:$0xff] }
   0x6   :  { %240 = vmatpush3.msra.mxu0 %v29_v3  ;;  %273 = vmatpush3.msra.mxu1 %v117_v7  ;;  %v112_v16 = vld [vmem:[%s470_s2 + $0x48] sm:$0xff]  ;;  %v22_v17 = vld [vmem:[%s469_s1 + $0x30] sm:$0xff]  ;;  %v111_v18 = vld [vmem:[%s470_s2 + $0x40] sm:$0xff] }
   0x7   :  { %241 = vmatprep.subr.mxu0 %v311_v0  ;;  %274 = vmatprep.subr.mxu1 %v311_v0  ;;  %v21_v19 = vld [vmem:[%s469_s1 + $0x28] sm:$0xff]  ;;  %v110_v20 = vld [vmem:[%s470_s2 + $0x38] sm:$0xff]  ;;  %v20_v21 = vld [vmem:[%s469_s1 + $0x20] sm:$0xff] }
   0x8   :  { %242 = vmatpush3.msra.mxu0 %v28_v4  ;;  %275 = vmatpush3.msra.mxu1 %v116_v8  ;;  %v109_v22 = vld [vmem:[%s470_s2 + $0x30] sm:$0xff]  ;;  %v19_v23 = vld [vmem:[%s469_s1 + $0x18] sm:$0xff]  ;;  %v108_v24 = vld [vmem:[%s470_s2 + $0x28] sm:$0xff] }
   0x9   :  { %243 = vmatprep.subr.mxu0 %v311_v0  ;;  %276 = vmatprep.subr.mxu1 %v311_v0  ;;  %v18_v25 = vld [vmem:[%s469_s1 + $0x10] sm:$0xff]  ;;  %v14_v26 = vld [vmem:[%s471_s0] sm:$0x3]  ;;  %v17_v28 = vld [vmem:[%s469_s1 + $0x8] sm:$0xff] }
   0xa   :  { %244 = vmatpush3.msra.mxu0 %v27_v6  ;;  %277 = vmatpush3.msra.mxu1 %v115_v10  ;;  %v107_v27 = vld [vmem:[%s470_s2 + $0x20] sm:$0xff]  ;;  %v106_v29 = vld [vmem:[%s470_s2 + $0x18] sm:$0xff]  ;;  %v15_v31 = vmul.f32 0.0625, %v14_v26  ;;  %v105_v32 = vld [vmem:[%s470_s2 + $0x10] sm:$0xff] }
   0xb   :  { %245 = vmatprep.subr.mxu0 %v311_v0  ;;  %278 = vmatprep.subr.mxu1 %v311_v0  ;;  %v16_v30 = vld [vmem:[%s469_s1] sm:$0xff]  ;;  %v104_v33 = vld [vmem:[%s470_s2 + $0x8] sm:$0xff] }
   0xc   :  { %246 = vmatpush3.msra.mxu0 %v26_v9  ;;  %279 = vmatpush3.msra.mxu1 %v114_v12  ;;  %v103_v34 = vld [vmem:[%s470_s2] sm:$0xff] }
   0xd   :  { %247 = vmatprep.subr.mxu0 %v311_v0  ;;  %280 = vmatprep.subr.mxu1 %v311_v0 }
   0xe   :  { %248 = vmatpush3.msra.mxu0 %v25_v11  ;;  %281 = vmatpush3.msra.mxu1 %v113_v14 }
   0xf   :  { %249 = vmatprep.subr.mxu0 %v311_v0  ;;  %282 = vmatprep.subr.mxu1 %v311_v0 }
  0x10   :  { %250 = vmatpush3.msra.mxu0 %v24_v13  ;;  %283 = vmatpush3.msra.mxu1 %v112_v16 }
  0x11   :  { %251 = vmatprep.subr.mxu0 %v311_v0  ;;  %284 = vmatprep.subr.mxu1 %v311_v0 }
  0x12   :  { %252 = vmatpush3.msra.mxu0 %v23_v15  ;;  %285 = vmatpush3.msra.mxu1 %v111_v18 }
  0x13   :  { %253 = vmatprep.subr.mxu0 %v311_v0  ;;  %286 = vmatprep.subr.mxu1 %v311_v0 }
  0x14   :  { %254 = vmatpush3.msra.mxu0 %v22_v17  ;;  %287 = vmatpush3.msra.mxu1 %v110_v20 }
  0x15   :  { %255 = vmatprep.subr.mxu0 %v311_v0  ;;  %288 = vmatprep.subr.mxu1 %v311_v0 }
  0x16   :  { %256 = vmatpush3.msra.mxu0 %v21_v19  ;;  %289 = vmatpush3.msra.mxu1 %v109_v22 }
  0x17   :  { %257 = vmatprep.subr.mxu0 %v311_v0  ;;  %290 = vmatprep.subr.mxu1 %v311_v0 }
  0x18   :  { %258 = vmatpush3.msra.mxu0 %v20_v21  ;;  %291 = vmatpush3.msra.mxu1 %v108_v24 }
  0x19   :  { %259 = vmatprep.subr.mxu0 %v311_v0  ;;  %292 = vmatprep.subr.mxu1 %v311_v0 }
  0x1a   :  { %260 = vmatpush3.msra.mxu0 %v19_v23  ;;  %293 = vmatpush3.msra.mxu1 %v107_v27 }
  0x1b   :  { %261 = vmatprep.subr.mxu0 %v311_v0  ;;  %294 = vmatprep.subr.mxu1 %v311_v0 }
  0x1c   :  { %262 = vmatpush3.msra.mxu0 %v18_v25  ;;  %295 = vmatpush3.msra.mxu1 %v106_v29 }
  0x1d   :  { %263 = vmatprep.subr.mxu0 %v311_v0  ;;  %296 = vmatprep.subr.mxu1 %v311_v0 }
  0x1e   :  { %264 = vmatpush3.msra.mxu0 %v17_v28  ;;  %297 = vmatpush3.msra.mxu1 %v105_v32 }
  0x1f   :  { %265 = vmatprep.subr.mxu0 %v311_v0  ;;  %298 = vmatprep.subr.mxu1 %v311_v0 }
  0x20   :  { %266 = vmatpush3.msra.mxu0 %v16_v30  ;;  %299 = vmatpush3.msra.mxu1 %v104_v33 }
  0x21   :  { %268 = vmatmul.mubr.f32.vlgmr.msra.gmra.mxu0 %v15_v31  ;;  %300 = vmatprep.subr.mxu1 %v311_v0 }
  0x22   :  { %301 = vmatpush3.msra.mxu1 %v103_v34 }
  0xe1   :  { %v98_v35 = vpop.f32.mrf.mxu0 }
  0xe2   :  { %v102_v36 = vmax.f32 %v98_v35, 0.0 }
  0xe3   :  { %v269_v37 = vpop.f32.mrf.mxu0 }
  0xe4   :  { %303 = vmatmul.mubr.f32.vlgmr.msra.gmra.mxu1 %v102_v36 }
 0x1a4   :  { %v185_v38 = vpop.f32.mrf.mxu1 }
 0x1a5   :  { %v200_v39 = vmul.f32 -1.442695, %v185_v38 }
 0x1a6   :  { %v304_v40 = vpop.f32.mrf.mxu1 }
 0x1a7   :  { %307 = vpow2.f32 %v200_v39 }
 0x1b4   :  { %v308_v41 = vpop.eup %307 }
 0x1b5   :  { %v192_v42 = vadd.f32 1.0, %v308_v41 }
 0x1b7   :  { %309 = vrcp.f32 %v192_v42 }
 0x1c4   :  { %v310_v43 = vpop.eup %309 }
 0x1c5   :  { %195 = vst [vmem:[%s472_s3] sm:$0x3] %v310_v43 }

// kernel: _forward.13
= control target key start
LH: loop header
LB: loop body
LE: loop exit
PB: predicated region body
PF: predicated region fallthrough
CT: control target
= control target key end

     0   :  { %v311_v0 = vmov 0.0   ;;  %vm312_vm0 = vmmov 0   ;;  %s469_s1 = inlined_call_operand.vmem [shape: f32[128,128], index: 1, kind: input, shape index: {}]   ;;  %s470_s2 = inlined_call_operand.vmem [shape: f32[128,128], index: 2, kind: input, shape index: {}]   ;;  %s471_s0 = inlined_call_operand.vmem [shape: f32[2,128], index: 0, kind: input, shape index: {}]   ;;  %s472_s3 = inlined_call_operand.vmem [shape: f32[2,128], index: 3, kind: output, shape index: {}]  }
   0x1   :  { %235 = vmatprep.subr.mxu0 %v311_v0  ;;  %v31_v1 = vld [vmem:[%s469_s1 + $0x78] sm:$0xff]  ;;  %v30_v2 = vld [vmem:[%s469_s1 + $0x70] sm:$0xff]  ;;  %267 = vmatprep.mubr.msk.f32.mxu0 %vm312_vm0, %v311_v0  ;;  %v29_v3 = vld [vmem:[%s469_s1 + $0x68] sm:$0xff] }
   0x2   :  { %236 = vmatpush3.msra.mxu0 %v31_v1  ;;  %270 = vmatprep.subr.mxu1 %v311_v0  ;;  %v28_v4 = vld [vmem:[%s469_s1 + $0x60] sm:$0xff]  ;;  %v118_v5 = vld [vmem:[%s470_s2 + $0x78] sm:$0xff]  ;;  %v117_v7 = vld [vmem:[%s470_s2 + $0x70] sm:$0xff] }
   0x3   :  { %237 = vmatprep.subr.mxu0 %v311_v0  ;;  %302 = vmatprep.mubr.msk.f32.mxu1 %vm312_vm0, %v311_v0  ;;  %v27_v6 = vld [vmem:[%s469_s1 + $0x58] sm:$0xff]  ;;  %v116_v8 = vld [vmem:[%s470_s2 + $0x68] sm:$0xff]  ;;  %v26_v9 = vld [vmem:[%s469_s1 + $0x50] sm:$0xff] }
   0x4   :  { %238 = vmatpush3.msra.mxu0 %v30_v2  ;;  %271 = vmatpush3.msra.mxu1 %v118_v5  ;;  %v115_v10 = vld [vmem:[%s470_s2 + $0x60] sm:$0xff]  ;;  %v25_v11 = vld [vmem:[%s469_s1 + $0x48] sm:$0xff]  ;;  %v114_v12 = vld [vmem:[%s470_s2 + $0x58] sm:$0xff] }
   0x5   :  { %239 = vmatprep.subr.mxu0 %v311_v0  ;;  %272 = vmatprep.subr.mxu1 %v311_v0  ;;  %v24_v13 = vld [vmem:[%s469_s1 + $0x40] sm:$0xff]  ;;  %v113_v14 = vld [vmem:[%s470_s2 + $0x50] sm:$0xff]  ;;  %v23_v15 = vld [vmem:[%s469_s1 + $0x38] sm:$0xff] }
   0x6   :  { %240 = vmatpush3.msra.mxu0 %v29_v3  ;;  %273 = vmatpush3.msra.mxu1 %v117_v7  ;;  %v112_v16 = vld [vmem:[%s470_s2 + $0x48] sm:$0xff]  ;;  %v22_v17 = vld [vmem:[%s469_s1 + $0x30] sm:$0xff]  ;;  %v111_v18 = vld [vmem:[%s470_s2 + $0x40] sm:$0xff] }
   0x7   :  { %241 = vmatprep.subr.mxu0 %v311_v0  ;;  %274 = vmatprep.subr.mxu1 %v311_v0  ;;  %v21_v19 = vld [vmem:[%s469_s1 + $0x28] sm:$0xff]  ;;  %v110_v20 = vld [vmem:[%s470_s2 + $0x38] sm:$0xff]  ;;  %v20_v21 = vld [vmem:[%s469_s1 + $0x20] sm:$0xff] }
   0x8   :  { %242 = vmatpush3.msra.mxu0 %v28_v4  ;;  %275 = vmatpush3.msra.mxu1 %v116_v8  ;;  %v109_v22 = vld [vmem:[%s470_s2 + $0x30] sm:$0xff]  ;;  %v19_v23 = vld [vmem:[%s469_s1 + $0x18] sm:$0xff]  ;;  %v108_v24 = vld [vmem:[%s470_s2 + $0x28] sm:$0xff] }
   0x9   :  { %243 = vmatprep.subr.mxu0 %v311_v0  ;;  %276 = vmatprep.subr.mxu1 %v311_v0  ;;  %v18_v25 = vld [vmem:[%s469_s1 + $0x10] sm:$0xff]  ;;  %v14_v26 = vld [vmem:[%s471_s0] sm:$0x3]  ;;  %v17_v28 = vld [vmem:[%s469_s1 + $0x8] sm:$0xff] }
   0xa   :  { %244 = vmatpush3.msra.mxu0 %v27_v6  ;;  %277 = vmatpush3.msra.mxu1 %v115_v10  ;;  %v107_v27 = vld [vmem:[%s470_s2 + $0x20] sm:$0xff]  ;;  %v106_v29 = vld [vmem:[%s470_s2 + $0x18] sm:$0xff]  ;;  %v15_v31 = vmul.f32 0.125, %v14_v26  ;;  %v105_v32 = vld [vmem:[%s470_s2 + $0x10] sm:$0xff] }
   0xb   :  { %245 = vmatprep.subr.mxu0 %v311_v0  ;;  %278 = vmatprep.subr.mxu1 %v311_v0  ;;  %v16_v30 = vld [vmem:[%s469_s1] sm:$0xff]  ;;  %v104_v33 = vld [vmem:[%s470_s2 + $0x8] sm:$0xff] }
   0xc   :  { %246 = vmatpush3.msra.mxu0 %v26_v9  ;;  %279 = vmatpush3.msra.mxu1 %v114_v12  ;;  %v103_v34 = vld [vmem:[%s470_s2] sm:$0xff] }
   0xd   :  { %247 = vmatprep.subr.mxu0 %v311_v0  ;;  %280 = vmatprep.subr.mxu1 %v311_v0 }
   0xe   :  { %248 = vmatpush3.msra.mxu0 %v25_v11  ;;  %281 = vmatpush3.msra.mxu1 %v113_v14 }
   0xf   :  { %249 = vmatprep.subr.mxu0 %v311_v0  ;;  %282 = vmatprep.subr.mxu1 %v311_v0 }
  0x10   :  { %250 = vmatpush3.msra.mxu0 %v24_v13  ;;  %283 = vmatpush3.msra.mxu1 %v112_v16 }
  0x11   :  { %251 = vmatprep.subr.mxu0 %v311_v0  ;;  %284 = vmatprep.subr.mxu1 %v311_v0 }
  0x12   :  { %252 = vmatpush3.msra.mxu0 %v23_v15  ;;  %285 = vmatpush3.msra.mxu1 %v111_v18 }
  0x13   :  { %253 = vmatprep.subr.mxu0 %v311_v0  ;;  %286 = vmatprep.subr.mxu1 %v311_v0 }
  0x14   :  { %254 = vmatpush3.msra.mxu0 %v22_v17  ;;  %287 = vmatpush3.msra.mxu1 %v110_v20 }
  0x15   :  { %255 = vmatprep.subr.mxu0 %v311_v0  ;;  %288 = vmatprep.subr.mxu1 %v311_v0 }
  0x16   :  { %256 = vmatpush3.msra.mxu0 %v21_v19  ;;  %289 = vmatpush3.msra.mxu1 %v109_v22 }
  0x17   :  { %257 = vmatprep.subr.mxu0 %v311_v0  ;;  %290 = vmatprep.subr.mxu1 %v311_v0 }
  0x18   :  { %258 = vmatpush3.msra.mxu0 %v20_v21  ;;  %291 = vmatpush3.msra.mxu1 %v108_v24 }
  0x19   :  { %259 = vmatprep.subr.mxu0 %v311_v0  ;;  %292 = vmatprep.subr.mxu1 %v311_v0 }
  0x1a   :  { %260 = vmatpush3.msra.mxu0 %v19_v23  ;;  %293 = vmatpush3.msra.mxu1 %v107_v27 }
  0x1b   :  { %261 = vmatprep.subr.mxu0 %v311_v0  ;;  %294 = vmatprep.subr.mxu1 %v311_v0 }
  0x1c   :  { %262 = vmatpush3.msra.mxu0 %v18_v25  ;;  %295 = vmatpush3.msra.mxu1 %v106_v29 }
  0x1d   :  { %263 = vmatprep.subr.mxu0 %v311_v0  ;;  %296 = vmatprep.subr.mxu1 %v311_v0 }
  0x1e   :  { %264 = vmatpush3.msra.mxu0 %v17_v28  ;;  %297 = vmatpush3.msra.mxu1 %v105_v32 }
  0x1f   :  { %265 = vmatprep.subr.mxu0 %v311_v0  ;;  %298 = vmatprep.subr.mxu1 %v311_v0 }
  0x20   :  { %266 = vmatpush3.msra.mxu0 %v16_v30  ;;  %299 = vmatpush3.msra.mxu1 %v104_v33 }
  0x21   :  { %268 = vmatmul.mubr.f32.vlgmr.msra.gmra.mxu0 %v15_v31  ;;  %300 = vmatprep.subr.mxu1 %v311_v0 }
  0x22   :  { %301 = vmatpush3.msra.mxu1 %v103_v34 }
  0xe1   :  { %v98_v35 = vpop.f32.mrf.mxu0 }
  0xe2   :  { %v102_v36 = vmax.f32 %v98_v35, 0.0 }
  0xe3   :  { %v269_v37 = vpop.f32.mrf.mxu0 }
  0xe4   :  { %303 = vmatmul.mubr.f32.vlgmr.msra.gmra.mxu1 %v102_v36 }
 0x1a4   :  { %v185_v38 = vpop.f32.mrf.mxu1 }
 0x1a5   :  { %v200_v39 = vmul.f32 -1.442695, %v185_v38 }
 0x1a6   :  { %v304_v40 = vpop.f32.mrf.mxu1 }
 0x1a7   :  { %307 = vpow2.f32 %v200_v39 }
 0x1b4   :  { %v308_v41 = vpop.eup %307 }
 0x1b5   :  { %v192_v42 = vadd.f32 1.0, %v308_v41 }
 0x1b7   :  { %309 = vrcp.f32 %v192_v42 }
 0x1c4   :  { %v310_v43 = vpop.eup %309 }
 0x1c5   :  { %195 = vst [vmem:[%s472_s3] sm:$0x3] %v310_v43 }

// kernel: _forward.12
= control target key start
LH: loop header
LB: loop body
LE: loop exit
PB: predicated region body
PF: predicated region fallthrough
CT: control target
= control target key end

     0   :  { %s275_s6 = smov 0   ;;  %s277_s7 = smov 0   ;;  %s305_s0 = inlined_call_operand.vmem [shape: bf16[2,8,128], index: 0, kind: input, shape index: {}]   ;;  %s306_s1 = inlined_call_operand.vmem [shape: f32[2,1,128], index: 1, kind: output, shape index: {}]  }
   0x1   :  { %s279_s8 = smov 0  }
   0x2 LB: > { %s23_s9 = sadd.s32 1, %s258_s7  ;;  %p211_p0 = scmp.ge.s32.totalorder %s262_s8, 1  ;;  %s262_s8 = sphi %s279_s8, %s11_s8   ;;  %s258_s7 = sphi %s277_s7, %s308_s7   ;;  %s254_s6 = sphi %s275_s6, %s307_s6  }
   0x3   : > { %p25_p1 = scmp.ge.s32.totalorder %s23_s9, 2  ;;  %p103_p2 = scmp.lt.s32.totalorder %s262_s8, 3 }
   0x5   : > { %s310_s9 = smov (%p25_p1, %s23_s9), 0  ;;  %p104_p3 = pnand %p211_p0, %p103_p2 }
   0x6   : > { %p123_p4 = scmp.lt.s32.totalorder (!%p104_p3), %s254_s6, 1 }
   0x7   : > { %107 = sbr.rel (%p104_p3) target bundleno = 33 (0x21), region = 24 }
   0xc   : > { %s312_s6 = smov (!%p123_p4, %s254_s6), 1  ;;  %v264_v0 = vmov 0.0  }
   0xd   : > { %s212_s10 = sshll.u32 %s312_s6, 2  ;;  %s132_s13 = scalar_lea.vmem %s306_s1, %s312_s6 }
   0xe   : > { %s129_s16 = scalar_lea.vmem %s305_s0, %s212_s10  ;;  %137 = vst [vmem:[%s132_s13] sm:$0x1] %v264_v0 }
   0xf   : > { %v139_v1 = vld [vmem:[%s129_s16] sm:$0xf] }
  0x10   : > { %v140_v2 = vunpack.c.l.bf16 %v139_v1 }
  0x12   : > { %v141_v3 = vrot.slane %v140_v2, 4 }
  0x14   : > { %v142_v4 = vadd.f32 %v141_v3, %v140_v2 }
  0x15   : > { %v138_v8 = vld [vmem:[%s132_s13] sm:$0x1] }
  0x16   : > { %v143_v5 = vrot.slane %v142_v4, 2 }
  0x18   : > { %v144_v6 = vadd.f32 %v143_v5, %v142_v4 }
  0x1a   : > { %v145_v7 = vrot.slane %v144_v6, 1 }
  0x1c   : > { %v146_v9 = vadd.f32 %v145_v7, %v144_v6 }
  0x1e   : > { %v147_v10 = vadd.f32 %v146_v9, %v138_v8 }
  0x20   : > { %148 = vst [vmem:[%s132_s13] sm:$0x1] %v147_v10 }
  0x21 PF: > { %s11_s8 = sadd.s32 1, %s262_s8   ;;  %s307_s6 = smov %s258_s7 }
  0x22   : > { %p8_p5 = scmp.ge.s32.totalorder %s11_s8, 4   ;;  %s308_s7 = smov %s310_s9 }
  0x24   :  { %10 = sbr.rel (!%p8_p5) target bundleno = 2 (0x2), region = 58 }

// kernel: _forward.14
= control target key start
LH: loop header
LB: loop body
LE: loop exit
PB: predicated region body
PF: predicated region fallthrough
CT: control target
= control target key end

     0   :  { %s277_s6 = smov 0   ;;  %s279_s7 = smov 0   ;;  %s307_s0 = inlined_call_operand.vmem [shape: bf16[2,4,128], index: 0, kind: input, shape index: {}]   ;;  %s308_s1 = inlined_call_operand.vmem [shape: f32[2,1,128], index: 1, kind: output, shape index: {}]  }
   0x1   :  { %s281_s8 = smov 0  }
   0x2 LB: > { %s23_s9 = sadd.s32 1, %s260_s7  ;;  %p213_p0 = scmp.ge.s32.totalorder %s264_s8, 1  ;;  %s264_s8 = sphi %s281_s8, %s11_s8   ;;  %s260_s7 = sphi %s279_s7, %s310_s7   ;;  %s256_s6 = sphi %s277_s6, %s309_s6  }
   0x3   : > { %p25_p1 = scmp.ge.s32.totalorder %s23_s9, 2  ;;  %p103_p2 = scmp.lt.s32.totalorder %s264_s8, 3 }
   0x5   : > { %s312_s9 = smov (%p25_p1, %s23_s9), 0  ;;  %p104_p3 = pnand %p213_p0, %p103_p2 }
   0x6   : > { %p123_p4 = scmp.lt.s32.totalorder (!%p104_p3), %s256_s6, 1 }
   0x7   : > { %107 = sbr.rel (%p104_p3) target bundleno = 34 (0x22), region = 24 }
   0xc   : > { %s314_s6 = smov (!%p123_p4, %s256_s6), 1  ;;  %v266_v0 = vmov 0.0   ;;  %vm141_vm0 = vcmask 1043456  }
   0xd   : > { %s214_s10 = sshll.u32 %s314_s6, 1  ;;  %s132_s13 = scalar_lea.vmem %s308_s1, %s314_s6 }
   0xe   : > { %s129_s16 = scalar_lea.vmem %s307_s0, %s214_s10  ;;  %137 = vst [vmem:[%s132_s13] sm:$0x1] %v266_v0 }
   0xf   : > { %v139_v1 = vld [vmem:[%s129_s16] sm:$0x3] }
  0x10   : > { %v140_v2 = vunpack.c.l.bf16 %v139_v1 }
  0x12   : > { %v142_v3 = vsel %vm141_vm0, %v140_v2, 0.0 }
  0x13   : > { %v143_v4 = vrot.slane %v142_v3, 4 }
  0x15   : > { %v144_v5 = vadd.f32 %v143_v4, %v142_v3  ;;  %v138_v9 = vld [vmem:[%s132_s13] sm:$0x1] }
  0x17   : > { %v145_v6 = vrot.slane %v144_v5, 2 }
  0x19   : > { %v146_v7 = vadd.f32 %v145_v6, %v144_v5 }
  0x1b   : > { %v147_v8 = vrot.slane %v146_v7, 1 }
  0x1d   : > { %v148_v10 = vadd.f32 %v147_v8, %v146_v7 }
  0x1f   : > { %v149_v11 = vadd.f32 %v148_v10, %v138_v9 }
  0x21   : > { %150 = vst [vmem:[%s132_s13] sm:$0x1] %v149_v11 }
  0x22 PF: > { %s11_s8 = sadd.s32 1, %s264_s8   ;;  %s309_s6 = smov %s260_s7 }
  0x23   : > { %p8_p5 = scmp.ge.s32.totalorder %s11_s8, 4   ;;  %s310_s7 = smov %s312_s9 }
  0x25   :  { %10 = sbr.rel (!%p8_p5) target bundleno = 2 (0x2), region = 58 }

// kernel: _forward.15
= control target key start
LH: loop header
LB: loop body
LE: loop exit
PB: predicated region body
PF: predicated region fallthrough
CT: control target
= control target key end

     0   :  { %v348_v1 = vmov 0.0   ;;  %vm349_vm0 = vmmov 0   ;;  %s507_s0 = inlined_call_operand.vmem [shape: f32[2,128], index: 0, kind: input, shape index: {}]   ;;  %s508_s1 = inlined_call_operand.vmem [shape: f32[128,128], index: 1, kind: input, shape index: {}]   ;;  %s509_s2 = inlined_call_operand.vmem [shape: f32[128,128], index: 2, kind: input, shape index: {}]   ;;  %s510_s3 = inlined_call_operand.hbm [shape: f32[2,128], index: 3, kind: output, shape index: {}]  }
   0x1   :  { %v32_v0 = vld [vmem:[%s508_s1 + $0x78] sm:$0xff]  ;;  %249 = vmatprep.subr.mxu0 %v348_v1  ;;  %v31_v2 = vld [vmem:[%s508_s1 + $0x70] sm:$0xff]  ;;  %281 = vmatprep.mubr.msk.f32.mxu0 %vm349_vm0, %v348_v1  ;;  %v30_v3 = vld [vmem:[%s508_s1 + $0x68] sm:$0xff] }
   0x2   :  { %250 = vmatpush3.msra.mxu0 %v32_v0  ;;  %284 = vmatprep.subr.mxu1 %v348_v1  ;;  %v29_v4 = vld [vmem:[%s508_s1 + $0x60] sm:$0xff]  ;;  %v119_v5 = vld [vmem:[%s509_s2 + $0x78] sm:$0xff]  ;;  %v118_v6 = vld [vmem:[%s509_s2 + $0x70] sm:$0xff] }
   0x3   :  { %251 = vmatprep.subr.mxu0 %v348_v1  ;;  %316 = vmatprep.mubr.msk.f32.mxu1 %vm349_vm0, %v348_v1  ;;  %v28_v7 = vld [vmem:[%s508_s1 + $0x58] sm:$0xff]  ;;  %v117_v8 = vld [vmem:[%s509_s2 + $0x68] sm:$0xff]  ;;  %v27_v9 = vld [vmem:[%s508_s1 + $0x50] sm:$0xff] }
   0x4   :  { %252 = vmatpush3.msra.mxu0 %v31_v2  ;;  %285 = vmatpush3.msra.mxu1 %v119_v5  ;;  %v116_v10 = vld [vmem:[%s509_s2 + $0x60] sm:$0xff] }
   0x5   :  { %253 = vmatprep.subr.mxu0 %v348_v1  ;;  %286 = vmatprep.subr.mxu1 %v348_v1 }
   0x6   :  { %254 = vmatpush3.msra.mxu0 %v30_v3  ;;  %287 = vmatpush3.msra.mxu1 %v118_v6 }
   0x7   :  { %255 = vmatprep.subr.mxu0 %v348_v1  ;;  %288 = vmatprep.subr.mxu1 %v348_v1 }
   0x8   :  { %256 = vmatpush3.msra.mxu0 %v29_v4  ;;  %289 = vmatpush3.msra.mxu1 %v117_v8 }
   0x9   :  { %257 = vmatprep.subr.mxu0 %v348_v1 }
   0xa   :  { %258 = vmatpush3.msra.mxu0 %v28_v7 }
   0xb   :  { %8 = vsyncpa [#allocation3], 0  ;;  %259 = vmatprep.subr.mxu0 %v348_v1  ;;  %v26_v11 = vld [vmem:[%s508_s1 + $0x48] sm:$0xff]  ;;  %290 = vmatprep.subr.mxu1 %v348_v1  ;;  %v115_v12 = vld [vmem:[%s509_s2 + $0x58] sm:$0xff]  ;;  %s350_s22 = smov [#allocation2]  }
   0xc   :  { %260 = vmatpush3.msra.mxu0 %v27_v9  ;;  %291 = vmatpush3.msra.mxu1 %v116_v10  ;;  %v25_v13 = vld [vmem:[%s508_s1 + $0x40] sm:$0xff]  ;;  %v114_v14 = vld [vmem:[%s509_s2 + $0x50] sm:$0xff]  ;;  %v24_v15 = vld [vmem:[%s508_s1 + $0x38] sm:$0xff]  ;;  %s206_s23 = sshll.u32 %s350_s22, 4  ;;  %s207_s23 = int_to_ptr.vmem [resolvable:$true] %s206_s23 }
   0xd   :  { %261 = vmatprep.subr.mxu0 %v348_v1  ;;  %292 = vmatprep.subr.mxu1 %v348_v1  ;;  %v113_v16 = vld [vmem:[%s509_s2 + $0x48] sm:$0xff]  ;;  %v23_v17 = vld [vmem:[%s508_s1 + $0x30] sm:$0xff]  ;;  %v112_v18 = vld [vmem:[%s509_s2 + $0x40] sm:$0xff]  ;;  %p331_p1 = scmp.lt.s32.totalorder %s207_s23, %s207_s23 }
   0xe   :  { %262 = vmatpush3.msra.mxu0 %v26_v11  ;;  %293 = vmatpush3.msra.mxu1 %v115_v12  ;;  %v22_v19 = vld [vmem:[%s508_s1 + $0x28] sm:$0xff]  ;;  %v111_v20 = vld [vmem:[%s509_s2 + $0x38] sm:$0xff]  ;;  %v21_v21 = vld [vmem:[%s508_s1 + $0x20] sm:$0xff] }
   0xf   :  { %263 = vmatprep.subr.mxu0 %v348_v1  ;;  %294 = vmatprep.subr.mxu1 %v348_v1  ;;  %v110_v22 = vld [vmem:[%s509_s2 + $0x30] sm:$0xff]  ;;  %v20_v23 = vld [vmem:[%s508_s1 + $0x18] sm:$0xff]  ;;  %v109_v24 = vld [vmem:[%s509_s2 + $0x28] sm:$0xff] }
  0x10   :  { %264 = vmatpush3.msra.mxu0 %v25_v13  ;;  %295 = vmatpush3.msra.mxu1 %v114_v14  ;;  %v19_v25 = vld [vmem:[%s508_s1 + $0x10] sm:$0xff]  ;;  %v108_v26 = vld [vmem:[%s509_s2 + $0x20] sm:$0xff]  ;;  %v18_v28 = vld [vmem:[%s508_s1 + $0x8] sm:$0xff] }
  0x11   :  { %265 = vmatprep.subr.mxu0 %v348_v1  ;;  %296 = vmatprep.subr.mxu1 %v348_v1  ;;  %v15_v27 = vld [vmem:[%s507_s0] sm:$0x3]  ;;  %v107_v29 = vld [vmem:[%s509_s2 + $0x18] sm:$0xff]  ;;  %v106_v32 = vld [vmem:[%s509_s2 + $0x10] sm:$0xff] }
  0x12   :  { %266 = vmatpush3.msra.mxu0 %v24_v15  ;;  %297 = vmatpush3.msra.mxu1 %v113_v16  ;;  %v17_v30 = vld [vmem:[%s508_s1] sm:$0xff]  ;;  %v16_v31 = vmul.f32 0.25, %v15_v27  ;;  %v105_v33 = vld [vmem:[%s509_s2 + $0x8] sm:$0xff] }
  0x13   :  { %267 = vmatprep.subr.mxu0 %v348_v1  ;;  %298 = vmatprep.subr.mxu1 %v348_v1  ;;  %v104_v34 = vld [vmem:[%s509_s2] sm:$0xff]  ;;  %s326_s2 = scalar_lea.vmem %s207_s23, 32 }
  0x14   :  { %268 = vmatpush3.msra.mxu0 %v23_v17  ;;  %299 = vmatpush3.msra.mxu1 %v112_v18  ;;  %p327_p0 = scmp.ne.s32.totalorder %s207_s23, %s326_s2  ;;  %p332_p2 = scmp.lt.s32.totalorder %s326_s2, %s326_s2 }
  0x15   :  { %269 = vmatprep.subr.mxu0 %v348_v1  ;;  %300 = vmatprep.subr.mxu1 %v348_v1 }
  0x16   :  { %270 = vmatpush3.msra.mxu0 %v22_v19  ;;  %301 = vmatpush3.msra.mxu1 %v111_v20  ;;  %p333_p3 = por %p332_p2, %p331_p1 }
  0x17   :  { %271 = vmatprep.subr.mxu0 %v348_v1  ;;  %302 = vmatprep.subr.mxu1 %v348_v1 }
  0x18   :  { %272 = vmatpush3.msra.mxu0 %v21_v21  ;;  %303 = vmatpush3.msra.mxu1 %v110_v22  ;;  %p334_p4 = pnand %p333_p3, %p327_p0 }
  0x19   :  { %273 = vmatprep.subr.mxu0 %v348_v1  ;;  %304 = vmatprep.subr.mxu1 %v348_v1 }
  0x1a   :  { %274 = vmatpush3.msra.mxu0 %v20_v23  ;;  %305 = vmatpush3.msra.mxu1 %v109_v24 }
  0x1b   :  { %275 = vmatprep.subr.mxu0 %v348_v1  ;;  %306 = vmatprep.subr.mxu1 %v348_v1 }
  0x1c   :  { %276 = vmatpush3.msra.mxu0 %v19_v25  ;;  %307 = vmatpush3.msra.mxu1 %v108_v26 }
  0x1d   :  { %277 = vmatprep.subr.mxu0 %v348_v1  ;;  %308 = vmatprep.subr.mxu1 %v348_v1 }
  0x1e   :  { %278 = vmatpush3.msra.mxu0 %v18_v28  ;;  %309 = vmatpush3.msra.mxu1 %v107_v29 }
  0x1f   :  { %279 = vmatprep.subr.mxu0 %v348_v1  ;;  %310 = vmatprep.subr.mxu1 %v348_v1 }
  0x20   :  { %280 = vmatpush3.msra.mxu0 %v17_v30  ;;  %311 = vmatpush3.msra.mxu1 %v106_v32 }
  0x21   :  { %282 = vmatmul.mubr.f32.vlgmr.msra.gmra.mxu0 %v16_v31  ;;  %312 = vmatprep.subr.mxu1 %v348_v1 }
  0x22   :  { %313 = vmatpush3.msra.mxu1 %v105_v33 }
  0x23   :  { %314 = vmatprep.subr.mxu1 %v348_v1 }
  0x24   :  { %315 = vmatpush3.msra.mxu1 %v104_v34 }
  0xe1   :  { %v99_v35 = vpop.f32.mrf.mxu0 }
  0xe2   :  { %v103_v36 = vmax.f32 %v99_v35, 0.0 }
  0xe3   :  { %v283_v37 = vpop.f32.mrf.mxu0 }
  0xe4   :  { %317 = vmatmul.mubr.f32.vlgmr.msra.gmra.mxu1 %v103_v36 }
 0x1a4   :  { %v186_v38 = vpop.f32.mrf.mxu1 }
 0x1a5   :  { %v214_v39 = vmul.f32 -1.442695, %v186_v38 }
 0x1a6   :  { %v318_v40 = vpop.f32.mrf.mxu1 }
 0x1a7   :  { %322 = vpow2.f32 %v214_v39 }
 0x1b4   :  { %v323_v41 = vpop.eup %322 }
 0x1b5   :  { %v193_v42 = vadd.f32 1.0, %v323_v41 }
 0x1b7   :  { %324 = vrcp.f32 %v193_v42 }
 0x1c4   :  { %v325_v43 = vpop.eup %324 }
 0x1c5   :  { %v196_v44 = vadd.f32 1.0, %v325_v43 }
 0x1c7   :  { %v197_v45 = vmul.f32 0.5, %v196_v44 }
 0x1c9   :  { %v198_v46 = vmul.f32 %v197_v45, %v16_v31 }
 0x1cb   :  { %199 = vst [vmem:[#allocation2] sm:$0x3] %v198_v46 }
 0x1cc   :  { %337 = shalt.err (!%p334_p4)
}
 0x1cd   :  { %209 = dma.vmem_to_hbm [thread:$0]  %s207_s23, 32, %s510_s3, [#allocation3]  }
 0x1ce   :  { %346 = dma.done.wait [#allocation3], 32  }
 0x1cf   :  { %347 = vsyncadd [#allocation3], 4294967264 }
 0x1d0   :  { %213 = vsyncpa [#allocation3], 1 }

</bundles_post_ra>
